<compile_context>
chip_gen: v6e
topology: v6e:2x2x1
jax: 0.10.0
libtpu: 0.0.40
codegen_flags: <defaults>
</compile_context>

<pallas_src>
import functools

import jax
import jax.numpy as jnp
from jax import lax
from jax.experimental import pallas as pl
from jax.experimental.pallas import tpu as pltpu

_PACK = 8          # time steps packed per lane-dense row
_LN_EPS = 1e-5     # nn.LayerNorm default


def _csgu_packed_kernel(x_ref, m_ref, wab_ref, r_ref, bias_ref, mask_ref,
                        out_ref, znext_ref, *, n_channels, pack, lorder, rows):
    """One (batch, time-tile) block per grid step, fully lane-dense.

    x_ref:     (rows, 16C) packed input; lane 2C*j + c = x_r[t=8r+j, c],
                           lane 2C*j + C + c = x_g[t=8r+j, c]
    m_ref:     (16C, 16C)  block-diagonal per-segment mean matrix (1/C on gate lanes)
    wab_ref:   (16C, 16C)  [A | B]: depthwise conv * gamma * linear folded; A = same-row
                           taps, B = taps crossing into the next packed row
    r_ref:     (16C, 8C)   0/1 residual-lane compaction matrix
    bias_ref:  (1, 8C)     folded bias (beta, conv bias, linear bias), tiled over segments
    mask_ref:  (1, 16C)    1.0 on gate lanes, 0.0 on residual lanes
    out_ref:   (rows, 8C)  packed output: lane C*j + c = out[t=8r+j, c]
    znext_ref: (rows+8, 8C) f32 scratch; row 7 carries the previous tile's last-row
                           cross-row conv contribution (the causal carry).
    """
    C = n_channels
    G = C * pack
    t_idx = pl.program_id(1)

    xa = x_ref[...].astype(jnp.float32)                          # (rows, 16C)

    # Residual lanes -> compact (rows, 8C) layout via one 0/1 matmul (MXU, exact).
    x_r = jnp.dot(xa, r_ref[...], preferred_element_type=jnp.float32)

    # Per-time-step LayerNorm over the C gate lanes of each 2C-lane segment.
    # Two-pass mean/var; gate lanes isolated with a select so NaN/Inf in the residual
    # half of x cannot leak into the gate (matches the reference semantics).
    gate_lane = jnp.broadcast_to(mask_ref[...], xa.shape) > 0.5
    xg = jnp.where(gate_lane, xa, 0.0)
    meanb = jnp.dot(xg, m_ref[...], preferred_element_type=jnp.float32)
    d = xg - meanb                                               # exactly 0 on residual lanes
    varb = jnp.dot(d * d, m_ref[...], preferred_element_type=jnp.float32)
    xhat = d * lax.rsqrt(varb + _LN_EPS)                         # exactly 0 on residual lanes

    # Causal depthwise Conv1d (over time) + linear-after-conv folded into one matmul.
    # z[:, :G]  = taps that stay inside the packed row,
    # z[:, G:]  = each row's contribution to the NEXT packed row (taps crossing the
    #             8-step row boundary).
    z = jnp.dot(xhat, wab_ref[...], preferred_element_type=jnp.float32)   # (rows, 2G)
    z_self = z[:, :G]
    z_next = z[:, G:]

    if lorder > 0:
        @pl.when(t_idx == 0)
        def _init():   # new batch element: zero causal carry (left zero padding)
            znext_ref[pl.ds(0, 8), :] = jnp.zeros((8, G), jnp.float32)

        @pl.when(t_idx > 0)
        def _carry():  # carry the previous tile's last-row contribution forward
            znext_ref[pl.ds(7, 1), :] = znext_ref[pl.ds(8 + rows - 1, 1), :]

        znext_ref[pl.ds(8, rows), :] = z_next                    # 8-sublane-aligned store
        prev = znext_ref[pl.ds(7, rows), :]                      # rows shifted down by one
        gate = z_self + prev + bias_ref[...]
    else:
        gate = z_self + bias_ref[...]

    # gate_activation == 'identity'; dropout is identity at inference time.
    out_ref[...] = (x_r * gate).astype(out_ref.dtype)


def _fold_params_packed(params, kernel_size, n_channels, pack, use_linear_after_conv):
    """Build the lane-packed, block-diagonal folded parameter matrices.

    Exact under this module's op order (zero-pad the raw gate, THEN LayerNorm): padded
    frames normalize to exactly beta, so
        gate = sum_s (conv_w[lorder-s]*gamma*lin_w) . xhat[t-s]
               + (beta*sum_k conv_w[k] + conv_b) @ lin_w + lin_b
    with xhat == 0 at padded positions (handled by the zero causal carry in the kernel).
    """
    C, K = n_channels, kernel_size
    f32 = jnp.float32
    lorder = K - 1
    L = 2 * C * pack           # packed input lanes per row
    G = C * pack               # packed output lanes per row

    gamma = params["ln_gamma"].astype(f32).reshape(C)
    beta = params["ln_beta"].astype(f32).reshape(C)
    conv_w = params["conv_w"].astype(f32).reshape(K, C)   # conv_w[k, c] == torch conv.weight[c, 0, k]
    conv_b = params["conv_b"].astype(f32).reshape(C)
    if use_linear_after_conv:
        lin_w = params["lin_w"].astype(f32).reshape(C, C)  # (in, out) == torch linear.weight.T
        lin_b = params["lin_b"].astype(f32).reshape(C)
    else:  # linear == identity
        lin_w = jnp.eye(C, dtype=f32)
        lin_b = jnp.zeros((C,), f32)

    # wcs[s, c] = conv tap applied to xhat[t - s], with gamma folded in.
    wcs = conv_w[::-1] * gamma[None, :]                    # (K, C), wcs[s] = conv_w[lorder-s]*gamma

    # Per-segment mean matrix (rows and columns only at gate lanes).
    w_m = jnp.zeros((L, L), f32)
    blk = jnp.full((C, C), 1.0 / C, f32)
    for j in range(pack):
        r0 = 2 * C * j + C
        w_m = w_m.at[r0:r0 + C, r0:r0 + C].set(blk)

    # Folded conv+linear: A = same-row taps, B = taps crossing into the next packed row.
    w_a = jnp.zeros((L, G), f32)
    w_b = jnp.zeros((L, G), f32)
    for j in range(pack):
        for s in range(lorder + 1):
            block = wcs[s][:, None] * lin_w                # (C, C): [c, co]
            m = j - s
            if m >= 0:
                w_a = w_a.at[2 * C * m + C:2 * C * m + 2 * C, C * j:C * (j + 1)].add(block)
            else:
                mm = pack + m
                w_b = w_b.at[2 * C * mm + C:2 * C * mm + 2 * C, C * j:C * (j + 1)].add(block)
    w_ab = jnp.concatenate([w_a, w_b], axis=1)             # (L, 2G)

    # Residual-lane compaction (0/1 selection -> exact through the MXU).
    w_r = jnp.zeros((L, G), f32)
    eye_c = jnp.eye(C, dtype=f32)
    for j in range(pack):
        w_r = w_r.at[2 * C * j:2 * C * j + C, C * j:C * (j + 1)].set(eye_c)

    # Folded bias: (beta*sum_k conv_w[k] + conv_b) @ lin_w + lin_b, tiled over segments.
    cb = beta * jnp.sum(conv_w, axis=0) + conv_b
    fb = cb @ lin_w + lin_b
    fbias = jnp.tile(fb, pack).reshape(1, G)

    # Gate-lane mask operand (1.0 on gate lanes, 0.0 on residual lanes).
    gmask = jnp.tile(jnp.concatenate([jnp.zeros((C,), f32), jnp.ones((C,), f32)]),
                     pack).reshape(1, L)
    return w_m, w_ab, w_r, fbias, gmask


def _plan_time_tiling(T, pack, target_steps):
    """Packed rows after padding, and packed rows per time tile (big-tile regime)."""
    rows_total = -(-T // pack)
    target_rows = max(1, target_steps // pack)
    if rows_total <= target_rows:
        tile_rows = rows_total                 # single tile: any row count (full dim) allowed
    else:
        tile_rows = max(8, (target_rows // 8) * 8)
    rows_padded = -(-rows_total // tile_rows) * tile_rows
    return rows_padded, tile_rows


def csgu_forward(x, params, kernel_size, *, causal=True, use_linear_after_conv=True,
                 gate_activation="identity", time_tile=8192):
    """x: (B, T, size). Returns (out (B, T, size//2), new_cache (B, size//2, lorder))."""
    assert causal, "TODO(synk): non-causal (symmetric padding) variant not implemented"
    assert gate_activation == "identity", (
        "TODO(synk): non-identity gate activations not implemented in the kernel")
    # TODO(synk): incoming streaming `cache` argument not supported; fake-cache path only.
    B, T, size = x.shape
    C = size // 2
    K = kernel_size
    lorder = K - 1
    pack = _PACK
    assert size == 2 * C
    assert lorder <= pack, "TODO(synk): kernel_size - 1 must be <= 8 for the one-row carry"
    assert size * pack <= 4096, "TODO(synk): packed-lane variant targets small n_channels"

    w_m, w_ab, w_r, fbias, gmask = _fold_params_packed(
        params, K, C, pack, use_linear_after_conv)

    rows_padded, tile_rows = _plan_time_tiling(T, pack, time_tile)
    Tp = rows_padded * pack
    x_p = jnp.pad(x, ((0, 0), (0, Tp - T), (0, 0))) if Tp != T else x
    x_pk = x_p.reshape(B, rows_padded, pack * size)        # free, contiguous relayout
    nT = rows_padded // tile_rows
    L = pack * size
    G = pack * C

    kernel = functools.partial(_csgu_packed_kernel, n_channels=C, pack=pack,
                               lorder=lorder, rows=tile_rows)

    out_pk = pl.pallas_call(
        kernel,
        out_shape=jax.ShapeDtypeStruct((B, rows_padded, G), x.dtype),
        grid=(B, nT),
        in_specs=[
            pl.BlockSpec((None, tile_rows, L), lambda b, t: (b, t, 0)),
            pl.BlockSpec((L, L), lambda b, t: (0, 0)),       # per-segment mean matrix
            pl.BlockSpec((L, 2 * G), lambda b, t: (0, 0)),   # folded conv+linear [A|B]
            pl.BlockSpec((L, G), lambda b, t: (0, 0)),       # residual compaction
            pl.BlockSpec((1, G), lambda b, t: (0, 0)),       # folded bias (tiled)
            pl.BlockSpec((1, L), lambda b, t: (0, 0)),       # gate-lane mask
        ],
        out_specs=pl.BlockSpec((None, tile_rows, G), lambda b, t: (b, t, 0)),
        scratch_shapes=[pltpu.VMEM((tile_rows + 8, G), jnp.float32)],
        compiler_params=pltpu.CompilerParams(
            dimension_semantics=("parallel", "arbitrary")),
    )(x_pk, w_m, w_ab, w_r, fbias, gmask)

    out = out_pk.reshape(B, Tp, C)[:, :T, :]

    # new_cache: last lorder frames of the (zero-left-padded) raw gate, as (B, C, lorder).
    if lorder > 0:
        if T >= lorder:
            tail = x[:, T - lorder:, C:]
        else:
            tail = jnp.concatenate(
                [jnp.zeros((B, lorder - T, C), x.dtype), x[:, :, C:]], axis=1)
        new_cache = jnp.transpose(tail, (0, 2, 1))
    else:
        new_cache = jnp.zeros((0, 0, 0), dtype=x.dtype)
    return out, new_cache


def csgu_reference(x, params, kernel_size, causal=True):
    """Pure-JAX reference mirroring the PyTorch forward (fake-cache path) exactly."""
    B, T, size = x.shape
    C = size // 2
    lorder = kernel_size - 1 if causal else 0
    x_r = x[..., :C]
    x_g = x[..., C:]
    xg_pad = jnp.pad(x_g, ((0, 0), (lorder, 0), (0, 0)))
    new_cache = jnp.transpose(xg_pad[:, xg_pad.shape[1] - lorder:, :], (0, 2, 1))
    mean = jnp.mean(xg_pad, axis=-1, keepdims=True)
    var = jnp.mean((xg_pad - mean) ** 2, axis=-1, keepdims=True)
    xn = (xg_pad - mean) / jnp.sqrt(var + _LN_EPS)
    xn = xn * params["ln_gamma"] + params["ln_beta"]
    y = jnp.zeros((B, T, C), jnp.float32)
    for k in range(kernel_size):
        y = y + xn[:, k:k + T, :] * params["conv_w"][k]
    y = y + params["conv_b"]
    y = jnp.einsum("btc,cd->btd", y, params["lin_w"]) + params["lin_b"]
    out = (x_r * y).astype(x.dtype)
    return out, new_cache


if __name__ == "__main__":
    B, SIZE, K = 2, 32, 3
    C = SIZE // 2

    key = jax.random.PRNGKey(0)
    kx, kg, kb, kcw, kcb, klw, klb, kx2 = jax.random.split(key, 8)
    params = {
        "ln_gamma": 1.0 + 0.1 * jax.random.normal(kg, (C,), dtype=jnp.float32),
        "ln_beta": 0.1 * jax.random.normal(kb, (C,), dtype=jnp.float32),
        # conv weight stored as (K, C): conv_w[k, c] == torch Conv1d weight[c, 0, k]
        "conv_w": 0.5 * jax.random.normal(kcw, (K, C), dtype=jnp.float32),
        "conv_b": 0.5 * jax.random.normal(kcb, (C,), dtype=jnp.float32),
        # linear weight stored pre-transposed as (in, out) == torch Linear weight.T
        "lin_w": 0.2 * jax.random.normal(klw, (C, C), dtype=jnp.float32),
        "lin_b": 0.2 * jax.random.normal(klb, (C,), dtype=jnp.float32),
    }

    # Test 1: tiny sequence -> single packed row, single time tile.
    T1 = 8
    x1 = jax.random.normal(kx, (B, T1, SIZE), dtype=jnp.float32)
    out1, cache1 = csgu_forward(x1, params, K)
    out1 = jax.block_until_ready(out1)
    cache1 = jax.block_until_ready(cache1)
    ref_out1, ref_cache1 = csgu_reference(x1, params, K)
    assert out1.shape == (B, T1, C), out1.shape
    assert cache1.shape == (B, C, K - 1), cache1.shape
    assert jnp.allclose(out1, ref_out1, atol=2e-4, rtol=2e-4), \
        float(jnp.max(jnp.abs(out1 - ref_out1)))
    assert jnp.allclose(cache1, ref_cache1), "cache mismatch vs reference"

    # Test 2: longer, non-multiple-of-tile sequence with a small forced tile ->
    # exercises wrapper-side padding + slicing AND the causal carry across time tiles.
    T2 = 200
    x2 = jax.random.normal(kx2, (B, T2, SIZE), dtype=jnp.float32)
    out2, cache2 = csgu_forward(x2, params, K, time_tile=64)
    out2 = jax.block_until_ready(out2)
    cache2 = jax.block_until_ready(cache2)
    ref_out2, ref_cache2 = csgu_reference(x2, params, K)
    assert out2.shape == (B, T2, C), out2.shape
    assert jnp.allclose(out2, ref_out2, atol=2e-4, rtol=2e-4), \
        float(jnp.max(jnp.abs(out2 - ref_out2)))
    assert jnp.allclose(cache2, ref_cache2), "cache mismatch vs reference (tiled)"

    print("KERNEL_OK")
</pallas_src>

<mosaic_0001>
module attributes {stable_mosaic.version = 11 : i64} {
  func.func @_csgu_packed_kernel(%arg0: i32, %arg1: i32, %arg2: memref<1x1x256xf32, #tpu.memory_space<vmem>>, %arg3: memref<256x256xf32, #tpu.memory_space<vmem>>, %arg4: memref<256x256xf32, #tpu.memory_space<vmem>>, %arg5: memref<256x128xf32, #tpu.memory_space<vmem>>, %arg6: memref<1x128xf32, #tpu.memory_space<vmem>>, %arg7: memref<1x256xf32, #tpu.memory_space<vmem>>, %arg8: memref<1x1x128xf32, #tpu.memory_space<vmem>>, %arg9: memref<9x128xf32, #tpu.memory_space<vmem>>) attributes {dimension_semantics = [#tpu.dimension_semantics<parallel>, #tpu.dimension_semantics<arbitrary>], iteration_bounds = array<i64: 2, 1>, scalar_prefetch = 0 : i64, scratch_operands = 1 : i64, tpu.core_type = #tpu.core_type<tc>, window_params = [{transform_indices = @transform_0, window_bounds = array<i64: 1, 1, 256>}, {pipeline_mode = #tpu.pipeline_mode<synchronous>, transform_indices = @transform_1, window_bounds = array<i64: 256, 256>}, {pipeline_mode = #tpu.pipeline_mode<synchronous>, transform_indices = @transform_2, window_bounds = array<i64: 256, 256>}, {pipeline_mode = #tpu.pipeline_mode<synchronous>, transform_indices = @transform_3, window_bounds = array<i64: 256, 128>}, {pipeline_mode = #tpu.pipeline_mode<synchronous>, transform_indices = @transform_4, window_bounds = array<i64: 1, 128>}, {pipeline_mode = #tpu.pipeline_mode<synchronous>, transform_indices = @transform_5, window_bounds = array<i64: 1, 256>}, {transform_indices = @transform_6, window_bounds = array<i64: 1, 1, 128>}]} {
    %c0 = arith.constant 0 : index
    %c0_0 = arith.constant 0 : index
    %c0_1 = arith.constant 0 : index
    %0 = vector.load %arg2[%c0, %c0_0, %c0_1] : memref<1x1x256xf32, #tpu.memory_space<vmem>>, vector<1x1x256xf32>
    %1 = vector.shape_cast %0 : vector<1x1x256xf32> to vector<1x256xf32>
    %c0_2 = arith.constant 0 : index
    %c0_3 = arith.constant 0 : index
    %2 = vector.load %arg5[%c0_2, %c0_3] : memref<256x128xf32, #tpu.memory_space<vmem>>, vector<256x128xf32>
    %cst = arith.constant dense<0.000000e+00> : vector<1x128xf32>
    %3 = tpu.matmul %1, %2, %cst {dimension_numbers = #tpu.dot_dimension_numbers<[1], [0], [0], [1], [0, 0, 1, 1], [], []>} : vector<1x256xf32>, vector<256x128xf32>, vector<1x128xf32> -> vector<1x128xf32>
    %c0_4 = arith.constant 0 : index
    %c0_5 = arith.constant 0 : index
    %4 = vector.load %arg7[%c0_4, %c0_5] : memref<1x256xf32, #tpu.memory_space<vmem>>, vector<1x256xf32>
    %cst_6 = arith.constant 5.000000e-01 : f32
    %5 = vector.broadcast %cst_6 : f32 to vector<1x256xf32>
    %6 = arith.cmpf ogt, %4, %5 : vector<1x256xf32>
    %cst_7 = arith.constant 0.000000e+00 : f32
    %7 = vector.broadcast %cst_7 : f32 to vector<1x256xf32>
    %8 = arith.select %6, %1, %7 : vector<1x256xi1>, vector<1x256xf32>
    %c0_8 = arith.constant 0 : index
    %c0_9 = arith.constant 0 : index
    %9 = vector.load %arg3[%c0_8, %c0_9] : memref<256x256xf32, #tpu.memory_space<vmem>>, vector<256x256xf32>
    %cst_10 = arith.constant dense<0.000000e+00> : vector<1x256xf32>
    %10 = tpu.matmul %8, %9, %cst_10 {dimension_numbers = #tpu.dot_dimension_numbers<[1], [0], [0], [1], [0, 0, 1, 1], [], []>} : vector<1x256xf32>, vector<256x256xf32>, vector<1x256xf32> -> vector<1x256xf32>
    %11 = arith.subf %8, %10 : vector<1x256xf32>
    %12 = arith.mulf %11, %11 : vector<1x256xf32>
    %c0_11 = arith.constant 0 : index
    %c0_12 = arith.constant 0 : index
    %13 = vector.load %arg3[%c0_11, %c0_12] : memref<256x256xf32, #tpu.memory_space<vmem>>, vector<256x256xf32>
    %cst_13 = arith.constant dense<0.000000e+00> : vector<1x256xf32>
    %14 = tpu.matmul %12, %13, %cst_13 {dimension_numbers = #tpu.dot_dimension_numbers<[1], [0], [0], [1], [0, 0, 1, 1], [], []>} : vector<1x256xf32>, vector<256x256xf32>, vector<1x256xf32> -> vector<1x256xf32>
    %cst_14 = arith.constant 9.99999974E-6 : f32
    %15 = vector.broadcast %cst_14 : f32 to vector<1x256xf32>
    %16 = arith.addf %14, %15 : vector<1x256xf32>
    %17 = math.rsqrt %16 : vector<1x256xf32>
    %18 = arith.mulf %11, %17 : vector<1x256xf32>
    %c0_15 = arith.constant 0 : index
    %c0_16 = arith.constant 0 : index
    %19 = vector.load %arg4[%c0_15, %c0_16] : memref<256x256xf32, #tpu.memory_space<vmem>>, vector<256x256xf32>
    %cst_17 = arith.constant dense<0.000000e+00> : vector<1x256xf32>
    %20 = tpu.matmul %18, %19, %cst_17 {dimension_numbers = #tpu.dot_dimension_numbers<[1], [0], [0], [1], [0, 0, 1, 1], [], []>} : vector<1x256xf32>, vector<256x256xf32>, vector<1x256xf32> -> vector<1x256xf32>
    %21 = vector.extract_strided_slice %20 {offsets = [0, 0], sizes = [1, 128], strides = [1, 1]} : vector<1x256xf32> to vector<1x128xf32>
    %22 = vector.extract_strided_slice %20 {offsets = [0, 128], sizes = [1, 128], strides = [1, 1]} : vector<1x256xf32> to vector<1x128xf32>
    %c0_i32 = arith.constant 0 : i32
    %23 = arith.cmpi eq, %arg1, %c0_i32 : i32
    %24 = arith.extui %23 : i1 to i32
    %c0_i32_18 = arith.constant 0 : i32
    %25 = arith.cmpi ne, %24, %c0_i32_18 : i32
    scf.if %25 {
      %cst_28 = arith.constant 0.000000e+00 : f32
      %38 = vector.broadcast %cst_28 : f32 to vector<8x128xf32>
      %c0_29 = arith.constant 0 : index
      %c0_30 = arith.constant 0 : index
      %39 = vector.load %arg9[%c0_29, %c0_30] : memref<9x128xf32, #tpu.memory_space<vmem>>, vector<8x128xf32>
      tpu.vector_store %arg9[%c0_29, %c0_30], %38 {strides = array<i32>} : memref<9x128xf32, #tpu.memory_space<vmem>>, vector<8x128xf32>,
    } else {
    }
    %c0_i32_19 = arith.constant 0 : i32
    %26 = arith.cmpi sgt, %arg1, %c0_i32_19 : i32
    %27 = arith.extui %26 : i1 to i32
    %c0_i32_20 = arith.constant 0 : i32
    %28 = arith.cmpi ne, %27, %c0_i32_20 : i32
    scf.if %28 {
      %c8_28 = arith.constant 8 : index
      %c0_29 = arith.constant 0 : index
      %38 = vector.load %arg9[%c8_28, %c0_29] : memref<9x128xf32, #tpu.memory_space<vmem>>, vector<1x128xf32>
      %c7_30 = arith.constant 7 : index
      %c0_31 = arith.constant 0 : index
      %39 = vector.load %arg9[%c7_30, %c0_31] : memref<9x128xf32, #tpu.memory_space<vmem>>, vector<1x128xf32>
      tpu.vector_store %arg9[%c7_30, %c0_31], %38 {strides = array<i32>} : memref<9x128xf32, #tpu.memory_space<vmem>>, vector<1x128xf32>,
    } else {
    }
    %c8 = arith.constant 8 : index
    %c0_21 = arith.constant 0 : index
    %29 = vector.load %arg9[%c8, %c0_21] : memref<9x128xf32, #tpu.memory_space<vmem>>, vector<1x128xf32>
    tpu.vector_store %arg9[%c8, %c0_21], %22 {strides = array<i32>} : memref<9x128xf32, #tpu.memory_space<vmem>>, vector<1x128xf32>,
    %c7 = arith.constant 7 : index
    %c0_22 = arith.constant 0 : index
    %30 = vector.load %arg9[%c7, %c0_22] : memref<9x128xf32, #tpu.memory_space<vmem>>, vector<1x128xf32>
    %31 = arith.addf %21, %30 : vector<1x128xf32>
    %c0_23 = arith.constant 0 : index
    %c0_24 = arith.constant 0 : index
    %32 = vector.load %arg6[%c0_23, %c0_24] : memref<1x128xf32, #tpu.memory_space<vmem>>, vector<1x128xf32>
    %33 = arith.addf %31, %32 : vector<1x128xf32>
    %34 = arith.mulf %3, %33 : vector<1x128xf32>
    %c0_25 = arith.constant 0 : index
    %c0_26 = arith.constant 0 : index
    %c0_27 = arith.constant 0 : index
    %35 = vector.load %arg8[%c0_25, %c0_26, %c0_27] : memref<1x1x128xf32, #tpu.memory_space<vmem>>, vector<1x1x128xf32>
    %36 = vector.shape_cast %35 : vector<1x1x128xf32> to vector<1x128xf32>
    %37 = vector.shape_cast %34 : vector<1x128xf32> to vector<1x1x128xf32>
    tpu.vector_store %arg8[%c0_25, %c0_26, %c0_27], %37 {strides = array<i32>} : memref<1x1x128xf32, #tpu.memory_space<vmem>>, vector<1x1x128xf32>,
    return
  }
  func.func @transform_0(%arg0: i32, %arg1: i32) -> (i32, i32, i32) {
    %c0_i32 = arith.constant 0 : i32
    %c0_i32_0 = arith.constant 0 : i32
    return %arg0, %arg1, %c0_i32 : i32, i32, i32
  }
  func.func @transform_1(%arg0: i32, %arg1: i32) -> (i32, i32) {
    %c0_i32 = arith.constant 0 : i32
    %c0_i32_0 = arith.constant 0 : i32
    %c0_i32_1 = arith.constant 0 : i32
    return %c0_i32, %c0_i32_0 : i32, i32
  }
  func.func @transform_2(%arg0: i32, %arg1: i32) -> (i32, i32) {
    %c0_i32 = arith.constant 0 : i32
    %c0_i32_0 = arith.constant 0 : i32
    %c0_i32_1 = arith.constant 0 : i32
    return %c0_i32, %c0_i32_0 : i32, i32
  }
  func.func @transform_3(%arg0: i32, %arg1: i32) -> (i32, i32) {
    %c0_i32 = arith.constant 0 : i32
    %c0_i32_0 = arith.constant 0 : i32
    %c0_i32_1 = arith.constant 0 : i32
    return %c0_i32, %c0_i32_0 : i32, i32
  }
  func.func @transform_4(%arg0: i32, %arg1: i32) -> (i32, i32) {
    %c0_i32 = arith.constant 0 : i32
    %c0_i32_0 = arith.constant 0 : i32
    %c0_i32_1 = arith.constant 0 : i32
    return %c0_i32, %c0_i32_0 : i32, i32
  }
  func.func @transform_5(%arg0: i32, %arg1: i32) -> (i32, i32) {
    %c0_i32 = arith.constant 0 : i32
    %c0_i32_0 = arith.constant 0 : i32
    %c0_i32_1 = arith.constant 0 : i32
    return %c0_i32, %c0_i32_0 : i32, i32
  }
  func.func @transform_6(%arg0: i32, %arg1: i32) -> (i32, i32, i32) {
    %c0_i32 = arith.constant 0 : i32
    %c0_i32_0 = arith.constant 0 : i32
    return %arg0, %arg1, %c0_i32 : i32, i32, i32
  }
}

</mosaic_0001>

<bundles_post_ra>
// kernel: tpu_custom_call.1
= control target key start
LH: loop header
LB: loop body
LE: loop exit
PB: predicated region body
PF: predicated region fallthrough
CT: control target
= control target key end

     0   :  { %s1889_s0 = inlined_call_operand.hbm [shape: f32[2,1,256], index: 0, kind: input, shape index: {}]   ;;  %s1890_s1 = inlined_call_operand.hbm [shape: f32[256,256], index: 1, kind: input, shape index: {}]   ;;  %s1891_s2 = inlined_call_operand.hbm [shape: f32[256,256], index: 2, kind: input, shape index: {}]   ;;  %s1892_s3 = inlined_call_operand.hbm [shape: f32[256,128], index: 3, kind: input, shape index: {}]   ;;  %s1893_s4 = inlined_call_operand.vmem [shape: f32[1,128], index: 4, kind: input, shape index: {}]   ;;  %s1894_s5 = inlined_call_operand.vmem [shape: f32[1,256], index: 5, kind: input, shape index: {}]   ;;  %s1895_s6 = inlined_call_operand.hbm [shape: f32[2,1,128], index: 6, kind: output, shape index: {}]  }
   0x1   :  { %1906 = sst [smem:[#allocation21_spill]] %s1890_s1 }
   0x2   :  { %1907 = sst [smem:[#allocation22_spill]] %s1891_s2 }
   0x3   :  { %11 = vsyncpa [#allocation4], 0 }
   0x4   :  { %13 = vsyncpa [#allocation4 + $0x1], 0 }
   0x5   :  { %14 = vsyncpa [#allocation7], 0 }
   0x6   :  { %15 = vsyncpa [#allocation10], 0 }
   0x7   :  { %16 = vsyncpa [#allocation5], 0 }
   0x8   :  { %18 = vsyncpa [#allocation5 + $0x1], 0  ;;  %s1399_s21 = smov 0   ;;  %s1401_s22 = smov 0  }
   0x9   :  { %s1403_s23 = smov 0   ;;  %s1405_s24 = smov 0  }
   0xa   :  { %s1407_s25 = smov 0   ;;  %s1409_s26 = smov 0  }
   0xb LB: > { %s1000_s27 = sadd.s32 4294967295, %s1351_s26   ;;  %s1001_s28 = sadd.s32 4294967294, %s1351_s26   ;;  %s1351_s26 = sphi %s1409_s26, %s24_s26   ;;  %s1347_s25 = sphi %s1407_s25, %s1937_s25   ;;  %s1343_s24 = sphi %s1405_s24, %s1936_s24   ;;  %s1339_s23 = sphi %s1403_s23, %s1935_s23   ;;  %s1335_s22 = sphi %s1401_s22, %s1934_s22   ;;  %s1331_s21 = sphi %s1399_s21, %s1933_s21  }
   0xc   : > { %p58_p0 = scmp.ne.s32.totalorder %s1335_s22, %s1331_s21  ;;  %p1433_p1 = scmp.eq.s32.totalorder %s1000_s27, 0 }
   0xd   : > { %p1437_p2 = scmp.eq.s32.totalorder %s1000_s27, 1  ;;  %p195_p3 = scmp.eq.s32.totalorder %s1001_s28, 1 }
   0xe   : > { %s1908_s29 = scalar_select %p1433_p1, 1, 0 }
   0xf   : > { %p1443_p4 = por %p1433_p1, %p58_p0  ;;  %p1002_p5 = scmp.ge.s32.totalorder %s1351_s26, 1 }
  0x10   : > { %p1448_p6 = por %p195_p3, %p58_p0  ;;  %p202_p7 = scmp.lt.s32.totalorder %s1351_s26, 3 }
  0x11   : > { %s1910_s7 = scalar_select %p1443_p4, 1, 0 }
  0x12   : > { %s1911_s8 = scalar_select %p1448_p6, 1, 0 }
  0x13   : > { %p1453_p8 = pnand %p1002_p5, %p202_p7  ;;  %s1353_s10 = smov [#allocation6]  }
  0x14   : > { %s214_s11 = sshll.u32 %s1353_s10, 4  ;;  %s1354_s13 = smov [#allocation8]   ;;  %s215_s11 = int_to_ptr.vmem [resolvable:$true] %s214_s11 }
  0x15   : > { %s1912_s9 = scalar_select %p1453_p8, 1, 0 }
  0x16   : > { %p1070_p9 = pneg %p1453_p8  ;;  %s227_s14 = sshll.u32 %s1354_s13, 4  ;;  %s228_s14 = int_to_ptr.vmem [resolvable:$true] %s227_s14 }
  0x17   : > { %s1355_s15 = smov [#allocation9]   ;;  %s1168_s17 = scalar_lea.vmem %s215_s11, 8192 }
  0x18   : > { %p1462_p11 = pnand %p1070_p9, %p1433_p1  ;;  %s240_s16 = sshll.u32 %s1355_s15, 4  ;;  %s241_s16 = int_to_ptr.vmem [resolvable:$true] %s240_s16 }
  0x19   : > { %p1169_p13 = scmp.ne.s32.totalorder %s215_s11, %s1168_s17  ;;  %p1176_p5 = scmp.lt.s32.totalorder %s215_s11, %s215_s11 }
  0x1a   : > { %p1159_p12 = pneg %p1462_p11  ;;  %p1177_p7 = scmp.lt.s32.totalorder %s1168_s17, %s1168_s17 }
  0x1c   : > { %p1171_p0 = pnand %p1169_p13, %p1159_p12  ;;  %p1178_p9 = por %p1177_p7, %p1176_p5 }
  0x1e   : > { %p1172_p3 = pneg %p1171_p0 }
  0x20   : > { %p1179_p10 = pnand %p1178_p9, %p1172_p3 }
  0x22   : > { %1182 = shalt.err (!%p1179_p10)
}
  0x23   : > { %s1356_s18 = smov 256   ;;  %s1357_s19 = smov 16  }
  0x24   : > { %s1914_s1 = sld [smem:[#allocation21_spill]]  ;;  %s1194_s28 = scalar_lea.vmem %s228_s14, 8192 }
  0x25   : > { %p1195_p6 = scmp.ne.s32.totalorder %s228_s14, %s1194_s28  ;;  %p1202_p1 = scmp.lt.s32.totalorder %s228_s14, %s228_s14 }
  0x26   : > { %p1203_p4 = scmp.lt.s32.totalorder %s1194_s28, %s1194_s28 }
  0x27   : > { %p1197_p13 = pnand %p1195_p6, %p1159_p12 }
  0x28   : > { %p1204_p5 = por %p1203_p4, %p1202_p1 }
  0x29   : > { %p1198_p0 = pneg %p1197_p13 }
  0x2a   : > { %1073 = dma.hbm_to_vmem [thread:$0]  (!%p1462_p11), %s1914_s1, 8192, %s215_s11, [#allocation7], %s1356_s18, %s1356_s18, %s1357_s19  }
  0x2b   : > { %p1205_p3 = pnand %p1204_p5, %p1198_p0 }
  0x2d   : > { %1208 = shalt.err (!%p1205_p3)
}
  0x2e   : > { %s1915_s2 = sld [smem:[#allocation22_spill]]  ;;  %s1220_s11 = scalar_lea.vmem %s241_s16, 4096 }
  0x2f   : > { %p1221_p10 = scmp.ne.s32.totalorder %s241_s16, %s1220_s11  ;;  %p1228_p9 = scmp.lt.s32.totalorder %s241_s16, %s241_s16 }
  0x30   : > { %p1229_p13 = scmp.lt.s32.totalorder %s1220_s11, %s1220_s11 }
  0x31   : > { %p1223_p7 = pnand %p1221_p10, %p1159_p12 }
  0x32   : > { %p1230_p8 = por %p1229_p13, %p1228_p9 }
  0x33   : > { %p1224_p6 = pneg %p1223_p7 }
  0x34   : > { %1076 = dma.hbm_to_vmem [thread:$0]  (!%p1462_p11), %s1915_s2, 8192, %s228_s14, [#allocation7], %s1356_s18, %s1356_s18, %s1357_s19  }
  0x35   : > { %p1231_p1 = pnand %p1230_p8, %p1224_p6 }
  0x37   : > { %1234 = shalt.err (!%p1231_p1)
}
  0x38   : > { %s1358_s15 = smov 128   ;;  %s1359_s14 = smov 8  }
  0x39   : > { %1079 = dma.hbm_to_vmem [thread:$0]  (!%p1462_p11), %s1892_s3, 4096, %s241_s16, [#allocation10], %s1358_s15, %s1358_s15, %s1359_s14  }
  0x3a   : > { %s45_s19 = sadd.s32 1, %s1339_s23  ;;  %s36_s20 = sadd.s32 1, %s1347_s25 }
  0x3b   : > { %p52_p4 = scmp.ne.s32.totalorder %s1339_s23, %s1335_s22  ;;  %p38_p8 = scmp.ge.s32.totalorder %s36_s20, 2 }
  0x3c   : > { %p53_p12 = scmp.eq.s32.totalorder %s1351_s26, 0  ;;  %p1091_p5 = scmp.lt.s32.totalorder %s1351_s26, 2 }
  0x3d   : > { %p1499_p0 = por %p1437_p2, %p52_p4  ;;  %s1939_s20 = smov (%p38_p8, %s36_s20), 0 }
  0x3e   : > { %p54_p3 = por %p53_p12, %p52_p4  ;;  %s260_s12 = sand.u32 1, %s1339_s23  }
  0x3f   : > { %s40_s28 = ssub.s32 %s1347_s25, %s1939_s20  ;;  %s1007_s16 = sshll.u32 %s260_s12, 1 }
  0x40   : > { %p43_p10 = scmp.eq.s32.totalorder %s40_s28, 0  ;;  %s1018_s10 = sshll.u32 %s1347_s25, 5 }
  0x41   : > { %s272_s30 = scalar_lea.hbm %s1889_s0, %s1018_s10  ;;  %s264_s14 = scalar_lea.vmem [#allocation3], %s1007_s16 }
  0x42   : > { %s1511_s13 = scalar_select %p43_p10, %s1339_s23, %s45_s19  }
  0x43   : > { %s274_s17 = sshll.u32 %s264_s14, 4  ;;  %p1518_p2 = pnand %p1091_p5, %p54_p3  ;;  %s275_s17 = int_to_ptr.vmem [resolvable:$true] %s274_s17 }
  0x44   : > { %s261_s1 = scalar_lea.sflag [#allocation4], %s260_s12  ;;  %s1248_s28 = scalar_lea.vmem %s275_s17, 32 }
  0x45   : > { %p1237_p11 = pneg %p1518_p2  ;;  %p1249_p7 = scmp.ne.s32.totalorder %s275_s17, %s1248_s28 }
  0x46   : > { %s1360_s19 = smov [#allocation3]  }
  0x47   : > { %p1251_p6 = pnand %p1249_p7, %p1237_p11  ;;  %s1253_s2 = sshll.u32 %s1360_s19, 4  ;;  %s1254_s2 = int_to_ptr.vmem [resolvable:$false] %s1253_s2 }
  0x48   : > { %s1255_s10 = scalar_lea.vmem %s1254_s2, 64  ;;  %p1256_p13 = scmp.lt.s32.totalorder %s275_s17, %s1254_s2 }
  0x49   : > { %p1252_p9 = pneg %p1251_p6  ;;  %p1257_p1 = scmp.lt.s32.totalorder %s1255_s10, %s1248_s28 }
  0x4b   : > { %p1258_p4 = por %p1257_p1, %p1256_p13 }
  0x4d   : > { %p1259_p8 = pnand %p1258_p4, %p1252_p9 }
  0x4f   : > { %1262 = shalt.err (!%p1259_p8)
}
  0x50   : > { %1083 = dma.hbm_to_vmem [thread:$0]  (!%p1518_p2), %s272_s30, 32, %s275_s17, %s261_s1  }
  0x51   : > { %p1918_p12 = scmp.ne.s32.totalorder %s1912_s9, 0 }
  0x53   : > { %283 = sbr.rel (%p1918_p12) target bundleno = 804 (0x324), region = 44 }
  0x58   : > { %s1529_s12 = sand.u32 1, %s1335_s22   ;;  %p1919_p5 = scmp.ne.s32.totalorder %s1910_s7, 0 }
  0x59   : > { %s1011_s16 = sshll.u32 %s1529_s12, 1  ;;  %s286_s11 = scalar_lea.sflag [#allocation4], %s1529_s12 }
  0x5a   : > { %s1533_s15 = scalar_lea.vmem [#allocation3], %s1011_s16 }
  0x5b   : > { %1314 = dma.done.wait (%p1919_p5), %s286_s11, 32  }
  0x5c   : > { %1316 = vsyncadd (%p1919_p5), %s286_s11, 4294967264  ;;  %p1920_p3 = scmp.ne.s32.totalorder %s1908_s29, 0 }
  0x5e   : > { %1318 = dma.done.wait (%p1920_p3), [#allocation7], 16384  }
  0x5f   : > { %1320 = vsyncadd (%p1920_p3), [#allocation7], 4294950912 }
  0x60   : > { %1322 = dma.done.wait (%p1920_p3), [#allocation10], 4096  }
  0x61   : > { %1324 = vsyncadd (%p1920_p3), [#allocation10], 4294963200  ;;  %v1547_v0 = vld [vmem:[#allocation6 + $0xf8] sm:$0xff]  ;;  %v1549_v1 = vld [vmem:[#allocation6 + $0xf0] sm:$0xff]  ;;  %v363_v15 = vlaneseq  ;;  %s1015_s9 = sshll.u32 %s1343_s24, 4  ;;  %s328_s30 = scalar_lea.vmem [#allocation11], %s1529_s12 }
  0x62   : > { %v1551_v2 = vld [vmem:[#allocation6 + $0xe8] sm:$0xff]  ;;  %521 = vmatprep.subr.mxu1 %v1547_v0  ;;  %v1554_v3 = vld [vmem:[#allocation6 + $0xe0] sm:$0xff]  ;;  %v1557_v4 = vld [vmem:[#allocation6 + $0xd8] sm:$0xff]  ;;  %s893_s14 = sshll.u32 %s328_s30, 4  ;;  %s891_s28 = scalar_lea.hbm %s1895_s6, %s1015_s9  ;;  %s894_s14 = int_to_ptr.vmem [resolvable:$true] %s893_s14 }
  0x63   : > { %522 = vmatpush1.msra.mxu1 %v1549_v1  ;;  %v1560_v5 = vld [vmem:[#allocation6 + $0xd0] sm:$0xff]  ;;  %v1563_v6 = vld [vmem:[#allocation6 + $0xc8] sm:$0xff]  ;;  %v1566_v7 = vld [vmem:[#allocation6 + $0xc0] sm:$0xff]  ;;  %v1601_v20 = vshrl.u32 %v363_v15, 7  ;;  %s880_s19 = scalar_lea.sflag [#allocation5], %s1529_s12  ;;  %s1263_s10 = scalar_lea.vmem %s894_s14, 16 }
  0x64   : > { %523 = vmatprep.subr.mxu1 %v1551_v2  ;;  %v1569_v8 = vld [vmem:[#allocation6 + $0xb8] sm:$0xff]  ;;  %v1572_v9 = vld [vmem:[#allocation6 + $0xb0] sm:$0xff]  ;;  %v1575_v10 = vld [vmem:[#allocation6 + $0xa8] sm:$0xff]  ;;  %p1264_p10 = scmp.ne.s32.totalorder %s894_s14, %s1263_s10  ;;  %s1363_s16 = smov [#allocation11]  }
  0x65   : > { %524 = vmatpush1.msra.mxu1 %v1554_v3  ;;  %v1578_v11 = vld [vmem:[#allocation6 + $0xa0] sm:$0xff]  ;;  %v1581_v12 = vld [vmem:[#allocation6 + $0x98] sm:$0xff]  ;;  %v1584_v13 = vld [vmem:[#allocation6 + $0x90] sm:$0xff]  ;;  %1921 = vst [vmem:[#allocation16_spill] sm:$0xff] %v1601_v20  ;;  %v1618_v26 = vsub.s32 1, %v1601_v20  ;;  %s1267_s11 = sshll.u32 %s1363_s16, 4  ;;  %s1268_s11 = int_to_ptr.vmem [resolvable:$false] %s1267_s11 }
  0x66   : > { %525 = vmatprep.subr.mxu1 %v1557_v4  ;;  %v1587_v14 = vld [vmem:[#allocation6 + $0x88] sm:$0xff]  ;;  %v1590_v16 = vld [vmem:[#allocation6 + $0x80] sm:$0xff]  ;;  %v1593_v17 = vld [vmem:[#allocation6 + $0x78] sm:$0xff]  ;;  %p1265_p2 = pnand %p1264_p10, %p1499_p0  ;;  %s1269_s24 = scalar_lea.vmem %s1268_s11, 32 }
  0x67   : > { %526 = vmatpush1.msra.mxu1 %v1560_v5  ;;  %v1596_v18 = vld [vmem:[#allocation6 + $0x70] sm:$0xff]  ;;  %v1599_v19 = vld [vmem:[#allocation6 + $0x68] sm:$0xff]  ;;  %v1604_v21 = vld [vmem:[#allocation6 + $0x60] sm:$0xff]  ;;  %1922 = vst [vmem:[#allocation17_spill] sm:$0xff] %v1618_v26  ;;  %p1270_p7 = scmp.lt.s32.totalorder %s894_s14, %s1268_s11  ;;  %p1271_p6 = scmp.lt.s32.totalorder %s1269_s24, %s1263_s10 }
  0x68   : > { %527 = vmatprep.subr.mxu1 %v1563_v6  ;;  %v1607_v22 = vld [vmem:[#allocation6 + $0x58] sm:$0xff]  ;;  %v1610_v23 = vld [vmem:[#allocation6 + $0x50] sm:$0xff]  ;;  %v1613_v24 = vld [vmem:[#allocation6 + $0x48] sm:$0xff]  ;;  %p1266_p11 = pneg %p1265_p2 }
  0x69   : > { %528 = vmatpush1.msra.mxu1 %v1566_v7  ;;  %v1615_v25 = vld [vmem:[#allocation6 + $0x40] sm:$0xff]  ;;  %v1621_v27 = vld [vmem:[#allocation6 + $0x38] sm:$0xff]  ;;  %v443_v29 = vld [vmem:[%s1894_s5] sm:$0x3]  ;;  %p1272_p9 = por %p1271_p6, %p1270_p7 }
  0x6a   : > { %529 = vmatprep.subr.mxu1 %v1569_v8  ;;  %v1624_v28 = vld [vmem:[%s1533_s15] sm:$0x3]  ;;  %vm444_vm0 = vcmp.gt.f32.partialorder %v443_v29, 0.5  ;;  %v360_v32 = vld [vmem:[#allocation9 + $0xf0] sm:$0xff]  ;;  %v1637_v35 = vld [vmem:[#allocation6 + $0x28] sm:$0xff] }
  0x6b   : > { %530 = vmatpush1.msra.mxu1 %v1572_v9  ;;  %v361_v30 = vld [vmem:[#allocation9 + $0xf8] sm:$0xff]  ;;  %v1631_v33 = vld [vmem:[#allocation6 + $0x30] sm:$0xff]  ;;  %v1634_v34 = vsel %vm444_vm0, %v1624_v28, 0.0  ;;  %v1642_v38 = vld [vmem:[#allocation6 + $0x20] sm:$0xff]  ;;  %p1273_p13 = pnand %p1272_p9, %p1266_p11 }
  0x6c   : > { %531 = vmatprep.subr.mxu1 %v1575_v10  ;;  %v345_v31 = vld [vmem:[#allocation9 + $0x78] sm:$0xff]  ;;  %1019 = vmatprep.subr.mxu0 %v361_v30  ;;  %v518_v36 = vrot.slane %v1634_v34, %v1618_v26  ;;  %v344_v37 = vld [vmem:[#allocation9 + $0x70] sm:$0xff]  ;;  %v359_v39 = vld [vmem:[#allocation9 + $0xe8] sm:$0xff] }
  0x6d   : > { %532 = vmatpush1.msra.mxu1 %v1578_v11  ;;  %1020 = vmatpush3.msra.mxu0 %v345_v31  ;;  %v1645_v40 = vld [vmem:[#allocation6 + $0x18] sm:$0xff]  ;;  %v343_v41 = vld [vmem:[#allocation9 + $0x68] sm:$0xff]  ;;  %v1648_v42 = vld [vmem:[#allocation6 + $0x10] sm:$0xff] }
  0x6e   : > { %533 = vmatprep.subr.mxu1 %v1581_v12  ;;  %1021 = vmatprep.subr.mxu0 %v360_v32  ;;  %v358_v43 = vld [vmem:[#allocation9 + $0xe0] sm:$0xff]  ;;  %v1651_v44 = vld [vmem:[#allocation6 + $0x8] sm:$0xff]  ;;  %v357_v47 = vld [vmem:[#allocation9 + $0xd8] sm:$0xff] }
  0x6f   : > { %534 = vmatpush1.msra.mxu1 %v1584_v13  ;;  %585 = vmatprep.mubr.f32.mxu1 %v518_v36  ;;  %v342_v45 = vld [vmem:[#allocation9 + $0x60] sm:$0xff]  ;;  %v1657_v48 = vld [vmem:[#allocation6 + $0x1f8] sm:$0xff]  ;;  %v1660_v50 = vld [vmem:[#allocation6 + $0x1f0] sm:$0xff] }
  0x70   : > { %535 = vmatprep.subr.mxu1 %v1587_v14  ;;  %1022 = vmatpush3.msra.mxu0 %v344_v37  ;;  %v1654_v46 = vld [vmem:[#allocation6] sm:$0xff]  ;;  %v341_v49 = vld [vmem:[#allocation9 + $0x58] sm:$0xff]  ;;  %v356_v51 = vld [vmem:[#allocation9 + $0xd0] sm:$0xff] }
  0x71   : > { %536 = vmatpush1.msra.mxu1 %v1590_v16  ;;  %1023 = vmatprep.subr.mxu0 %v359_v39  ;;  %v1663_v52 = vld [vmem:[#allocation6 + $0x1e8] sm:$0xff]  ;;  %v340_v53 = vld [vmem:[#allocation9 + $0x50] sm:$0xff]  ;;  %v1666_v54 = vld [vmem:[#allocation6 + $0x1e0] sm:$0xff] }
  0x72   : > { %537 = vmatprep.subr.mxu1 %v1593_v17  ;;  %1024 = vmatpush3.msra.mxu0 %v343_v41  ;;  %v355_v55 = vld [vmem:[#allocation9 + $0xc8] sm:$0xff]  ;;  %v1669_v56 = vld [vmem:[#allocation6 + $0x1d8] sm:$0xff]  ;;  %v1672_v58 = vld [vmem:[#allocation6 + $0x1d0] sm:$0xff] }
  0x73   : > { %538 = vmatpush1.msra.mxu1 %v1596_v18  ;;  %1025 = vmatprep.subr.mxu0 %v358_v43  ;;  %v339_v57 = vld [vmem:[#allocation9 + $0x48] sm:$0xff]  ;;  %v354_v59 = vld [vmem:[#allocation9 + $0xc0] sm:$0xff]  ;;  %v353_v63 = vld [vmem:[#allocation9 + $0xb8] sm:$0xff] }
  0x74   : > { %539 = vmatprep.subr.mxu1 %v1599_v19  ;;  %1026 = vmatpush3.msra.mxu0 %v342_v45  ;;  %v1675_v60 = vld [vmem:[#allocation6 + $0x1c8] sm:$0xff]  ;;  %v338_v61 = vld [vmem:[#allocation9 + $0x40] sm:$0xff]  ;;  %v1681_v15 = vld [vmem:[#allocation6 + $0x1b8] sm:$0xff] }
  0x75   : > { %540 = vmatpush1.msra.mxu1 %v1604_v21  ;;  %1027 = vmatprep.subr.mxu0 %v357_v47  ;;  %v1678_v62 = vld [vmem:[#allocation6 + $0x1c0] sm:$0xff]  ;;  %v337_v29 = vld [vmem:[#allocation9 + $0x38] sm:$0xff]  ;;  %v1684_v30 = vld [vmem:[#allocation6 + $0x1b0] sm:$0xff] }
  0x76   : > { %541 = vmatprep.subr.mxu1 %v1607_v22  ;;  %1028 = vmatpush3.msra.mxu0 %v341_v49  ;;  %v352_v31 = vld [vmem:[#allocation9 + $0xb0] sm:$0xff]  ;;  %v1687_v32 = vld [vmem:[#allocation6 + $0x1a8] sm:$0xff]  ;;  %v1690_v37 = vld [vmem:[#allocation6 + $0x1a0] sm:$0xff] }
  0x77   : > { %542 = vmatpush1.msra.mxu1 %v1610_v23  ;;  %1029 = vmatprep.subr.mxu0 %v356_v51  ;;  %v336_v36 = vld [vmem:[#allocation9 + $0x30] sm:$0xff]  ;;  %v351_v39 = vld [vmem:[#allocation9 + $0xa8] sm:$0xff]  ;;  %v1693_v41 = vld [vmem:[#allocation6 + $0x198] sm:$0xff] }
  0x78   : > { %543 = vmatprep.subr.mxu1 %v1613_v24  ;;  %1030 = vmatpush3.msra.mxu0 %v340_v53  ;;  %v335_v43 = vld [vmem:[#allocation9 + $0x28] sm:$0xff]  ;;  %v1696_v45 = vld [vmem:[#allocation6 + $0x190] sm:$0xff]  ;;  %v350_v47 = vld [vmem:[#allocation9 + $0xa0] sm:$0xff] }
  0x79   : > { %544 = vmatpush1.msra.mxu1 %v1615_v25  ;;  %1031 = vmatprep.subr.mxu0 %v355_v55  ;;  %v1699_v49 = vld [vmem:[#allocation6 + $0x188] sm:$0xff]  ;;  %v334_v51 = vld [vmem:[#allocation9 + $0x20] sm:$0xff]  ;;  %v349_v55 = vld [vmem:[#allocation9 + $0x98] sm:$0xff] }
  0x7a   : > { %545 = vmatprep.subr.mxu1 %v1621_v27  ;;  %1032 = vmatpush3.msra.mxu0 %v339_v57  ;;  %v1702_v53 = vld [vmem:[#allocation6 + $0x180] sm:$0xff]  ;;  %v1705_v57 = vld [vmem:[#allocation6 + $0x178] sm:$0xff] }
  0x7b   : > { %546 = vmatpush1.msra.mxu1 %v1631_v33  ;;  %1033 = vmatprep.subr.mxu0 %v354_v59  ;;  %1923 = vst [vmem:[#allocation18_spill] sm:$0xff] %v1702_v53  ;;  %1924 = vst [vmem:[#allocation19_spill] sm:$0xff] %v1705_v57  ;;  %v333_v59 = vld [vmem:[#allocation9 + $0x18] sm:$0xff] }
  0x7c   : > { %547 = vmatprep.subr.mxu1 %v1637_v35  ;;  %1034 = vmatpush3.msra.mxu0 %v338_v61  ;;  %v1708_v61 = vld [vmem:[#allocation6 + $0x170] sm:$0xff] }
  0x7d   : > { %548 = vmatpush1.msra.mxu1 %v1642_v38  ;;  %1035 = vmatprep.subr.mxu0 %v353_v63  ;;  %1925 = vst [vmem:[#allocation20_spill] sm:$0xff] %v1708_v61  ;;  %v348_v63 = vld [vmem:[#allocation9 + $0x90] sm:$0xff] }
  0x7e   : > { %549 = vmatprep.subr.mxu1 %v1645_v40  ;;  %1036 = vmatpush3.msra.mxu0 %v337_v29  ;;  %v1711_v29 = vld [vmem:[#allocation6 + $0x168] sm:$0xff] }
  0x7f   : > { %550 = vmatpush1.msra.mxu1 %v1648_v42  ;;  %1037 = vmatprep.subr.mxu0 %v352_v31  ;;  %v332_v31 = vld [vmem:[#allocation9 + $0x10] sm:$0xff] }
  0x80   : > { %551 = vmatprep.subr.mxu1 %v1651_v44  ;;  %1038 = vmatpush3.msra.mxu0 %v336_v36  ;;  %v1714_v36 = vld [vmem:[#allocation6 + $0x160] sm:$0xff] }
  0x81   : > { %552 = vmatpush1.msra.mxu1 %v1654_v46  ;;  %1039 = vmatprep.subr.mxu0 %v351_v39  ;;  %v347_v39 = vld [vmem:[#allocation9 + $0x88] sm:$0xff] }
  0x82   : > { %553 = vmatprep.subr.mxu1 %v1657_v48  ;;  %1040 = vmatpush3.msra.mxu0 %v335_v43  ;;  %v1717_v43 = vld [vmem:[#allocation6 + $0x158] sm:$0xff] }
  0x83   : > { %554 = vmatpush2.msra.mxu1 %v1660_v50  ;;  %1041 = vmatprep.subr.mxu0 %v350_v47  ;;  %v331_v47 = vld [vmem:[#allocation9 + $0x8] sm:$0xff] }
  0x84   : > { %555 = vmatprep.subr.mxu1 %v1663_v52  ;;  %1042 = vmatpush3.msra.mxu0 %v334_v51  ;;  %v1720_v51 = vld [vmem:[#allocation6 + $0x150] sm:$0xff] }
  0x85   : > { %556 = vmatpush2.msra.mxu1 %v1666_v54  ;;  %1043 = vmatprep.subr.mxu0 %v349_v55  ;;  %v346_v55 = vld [vmem:[#allocation9 + $0x80] sm:$0xff] }
  0x86   : > { %557 = vmatprep.subr.mxu1 %v1669_v56  ;;  %1044 = vmatpush3.msra.mxu0 %v333_v59  ;;  %v330_v59 = vld [vmem:[#allocation9] sm:$0xff] }
  0x87   : > { %558 = vmatpush2.msra.mxu1 %v1672_v58  ;;  %1045 = vmatprep.subr.mxu0 %v348_v63  ;;  %v1731_v63 = vld [vmem:[#allocation6 + $0x140] sm:$0xff] }
  0x88   : > { %559 = vmatprep.subr.mxu1 %v1675_v60  ;;  %1046 = vmatpush3.msra.mxu0 %v332_v31  ;;  %v1736_v31 = vld [vmem:[#allocation6 + $0x138] sm:$0xff] }
  0x89   : > { %560 = vmatpush2.msra.mxu1 %v1678_v62  ;;  %1047 = vmatprep.subr.mxu0 %v347_v39  ;;  %v1739_v39 = vld [vmem:[#allocation6 + $0x130] sm:$0xff] }
  0x8a   : > { %561 = vmatprep.subr.mxu1 %v1681_v15  ;;  %1048 = vmatpush3.msra.mxu0 %v331_v47  ;;  %v1745_v47 = vld [vmem:[#allocation6 + $0x120] sm:$0xff] }
  0x8b   : > { %562 = vmatpush2.msra.mxu1 %v1684_v30  ;;  %1049 = vmatprep.subr.mxu0 %v346_v55  ;;  %v1752_v55 = vld [vmem:[#allocation6 + $0x110] sm:$0xff] }
  0x8c   : > { %563 = vmatprep.subr.mxu1 %v1687_v32  ;;  %1050 = vmatpush3.msra.mxu0 %v330_v59 }
  0x8d   : > { %564 = vmatpush2.msra.mxu1 %v1690_v37  ;;  %623 = vmatprep.subr.mxu0 %v1547_v0  ;;  %v1926_v0 = vld [vmem:[#allocation18_spill] sm:$0xff] }
  0x8e   : > { %565 = vmatprep.subr.mxu1 %v1693_v41 }
  0x8f   : > { %566 = vmatpush2.msra.mxu1 %v1696_v45 }
  0x90   : > { %567 = vmatprep.subr.mxu1 %v1699_v49 }
  0x91   : > { %568 = vmatpush2.msra.mxu1 %v1702_v53  ;;  %v1723_v53 = vsub.s32 0, %v1601_v20 }
  0x92   : > { %569 = vmatprep.subr.mxu1 %v1705_v57  ;;  %v1726_v57 = vld [vmem:[#allocation6 + $0x148] sm:$0xff] }
  0x93   : > { %570 = vmatpush2.msra.mxu1 %v1708_v61  ;;  %v370_v61 = vrot.slane %v1624_v28, %v1618_v26  ;;  %v366_v20 = vrot.slane %v1624_v28, %v1723_v53  ;;  %v1742_v26 = vld [vmem:[#allocation6 + $0x128] sm:$0xff]  ;;  %v1748_v28 = vld [vmem:[#allocation6 + $0x118] sm:$0xff]  ;;  %v514_v59 = vrot.slane %v1634_v34, %v1723_v53 }
  0x94   : > { %571 = vmatprep.subr.mxu1 %v1711_v29 }
  0x95   : > { %572 = vmatpush2.msra.mxu1 %v1714_v36  ;;  %437 = vmatprep.mubr.f32.mxu0 %v370_v61  ;;  %v1756_v61 = vld [vmem:[#allocation6 + $0x108] sm:$0xff] }
  0x96   : > { %573 = vmatprep.subr.mxu1 %v1717_v43  ;;  %438 = vmatmul.mubr.f32.vlgmr.msra.gmra.mxu0 %v366_v20  ;;  %v1760_v20 = vld [vmem:[#allocation6 + $0x100] sm:$0xff] }
  0x97   : > { %574 = vmatpush2.msra.mxu1 %v1720_v51  ;;  %624 = vmatpush1.msra.mxu0 %v1549_v1  ;;  %v1927_v1 = vld [vmem:[#allocation19_spill] sm:$0xff] }
  0x98   : > { %575 = vmatprep.subr.mxu1 %v1726_v57  ;;  %625 = vmatprep.subr.mxu0 %v1551_v2  ;;  %v1928_v2 = vld [vmem:[#allocation20_spill] sm:$0xff] }
  0x99   : > { %576 = vmatpush2.msra.mxu1 %v1731_v63  ;;  %626 = vmatpush1.msra.mxu0 %v1554_v3  ;;  %v746_v3 = vld [vmem:[#allocation8 + $0xf8] sm:$0xff] }
  0x9a   : > { %577 = vmatprep.subr.mxu1 %v1736_v31  ;;  %627 = vmatprep.subr.mxu0 %v1557_v4  ;;  %v745_v4 = vld [vmem:[#allocation8 + $0xf0] sm:$0xff] }
  0x9b   : > { %578 = vmatpush2.msra.mxu1 %v1739_v39  ;;  %628 = vmatpush1.msra.mxu0 %v1560_v5  ;;  %v744_v5 = vld [vmem:[#allocation8 + $0xe8] sm:$0xff] }
  0x9c   : > { %579 = vmatprep.subr.mxu1 %v1742_v26  ;;  %629 = vmatprep.subr.mxu0 %v1563_v6  ;;  %v743_v6 = vld [vmem:[#allocation8 + $0xe0] sm:$0xff] }
  0x9d   : > { %580 = vmatpush2.msra.mxu1 %v1745_v47  ;;  %630 = vmatpush1.msra.mxu0 %v1566_v7  ;;  %v742_v7 = vld [vmem:[#allocation8 + $0xd8] sm:$0xff] }
  0x9e   : > { %581 = vmatprep.subr.mxu1 %v1748_v28  ;;  %631 = vmatprep.subr.mxu0 %v1569_v8  ;;  %v741_v8 = vld [vmem:[#allocation8 + $0xd0] sm:$0xff] }
  0x9f   : > { %582 = vmatpush2.msra.mxu1 %v1752_v55  ;;  %632 = vmatpush1.msra.mxu0 %v1572_v9  ;;  %v740_v9 = vld [vmem:[#allocation8 + $0xc8] sm:$0xff] }
  0xa0   : > { %583 = vmatprep.subr.mxu1 %v1756_v61  ;;  %633 = vmatprep.subr.mxu0 %v1575_v10  ;;  %v739_v10 = vld [vmem:[#allocation8 + $0xc0] sm:$0xff] }
  0xa1   : > { %584 = vmatpush2.msra.mxu1 %v1760_v20  ;;  %634 = vmatpush1.msra.mxu0 %v1578_v11  ;;  %v738_v11 = vld [vmem:[#allocation8 + $0xb8] sm:$0xff] }
  0xa2   : > { %586 = vmatmul.mubr.f32.vlgmr.msra.gmra.mxu1 %v514_v59  ;;  %635 = vmatprep.subr.mxu0 %v1581_v12  ;;  %v737_v12 = vld [vmem:[#allocation8 + $0xb0] sm:$0xff]  ;;  %v766_v59 = vld [vmem:[#allocation8 + $0x198] sm:$0xff] }
  0xa3   : > { %636 = vmatpush1.msra.mxu0 %v1584_v13  ;;  %790 = vmatprep.subr.mxu1 %v746_v3  ;;  %v736_v13 = vld [vmem:[#allocation8 + $0xa8] sm:$0xff]  ;;  %v762_v3 = vld [vmem:[#allocation8 + $0x178] sm:$0xff] }
  0xa4   : > { %637 = vmatprep.subr.mxu0 %v1587_v14  ;;  %791 = vmatpush1.msra.mxu1 %v745_v4  ;;  %v735_v14 = vld [vmem:[#allocation8 + $0xa0] sm:$0xff]  ;;  %v761_v4 = vld [vmem:[#allocation8 + $0x170] sm:$0xff] }
  0xa5   : > { %638 = vmatpush1.msra.mxu0 %v1590_v16  ;;  %792 = vmatprep.subr.mxu1 %v744_v5  ;;  %v734_v16 = vld [vmem:[#allocation8 + $0x98] sm:$0xff]  ;;  %v760_v5 = vld [vmem:[#allocation8 + $0x168] sm:$0xff] }
  0xa6   : > { %639 = vmatprep.subr.mxu0 %v1593_v17  ;;  %793 = vmatpush1.msra.mxu1 %v743_v6  ;;  %v733_v17 = vld [vmem:[#allocation8 + $0x90] sm:$0xff]  ;;  %v759_v6 = vld [vmem:[#allocation8 + $0x160] sm:$0xff] }
  0xa7   : > { %640 = vmatpush1.msra.mxu0 %v1596_v18  ;;  %794 = vmatprep.subr.mxu1 %v742_v7  ;;  %v732_v18 = vld [vmem:[#allocation8 + $0x88] sm:$0xff]  ;;  %v758_v7 = vld [vmem:[#allocation8 + $0x158] sm:$0xff] }
  0xa8   : > { %641 = vmatprep.subr.mxu0 %v1599_v19  ;;  %795 = vmatpush1.msra.mxu1 %v741_v8  ;;  %v731_v19 = vld [vmem:[#allocation8 + $0x80] sm:$0xff]  ;;  %v757_v8 = vld [vmem:[#allocation8 + $0x150] sm:$0xff] }
  0xa9   : > { %642 = vmatpush1.msra.mxu0 %v1604_v21  ;;  %796 = vmatprep.subr.mxu1 %v740_v9  ;;  %v730_v21 = vld [vmem:[#allocation8 + $0x78] sm:$0xff]  ;;  %v756_v9 = vld [vmem:[#allocation8 + $0x148] sm:$0xff] }
  0xaa   : > { %643 = vmatprep.subr.mxu0 %v1607_v22  ;;  %797 = vmatpush1.msra.mxu1 %v739_v10  ;;  %v729_v22 = vld [vmem:[#allocation8 + $0x70] sm:$0xff]  ;;  %v755_v10 = vld [vmem:[#allocation8 + $0x140] sm:$0xff] }
  0xab   : > { %644 = vmatpush1.msra.mxu0 %v1610_v23  ;;  %798 = vmatprep.subr.mxu1 %v738_v11  ;;  %v728_v23 = vld [vmem:[#allocation8 + $0x68] sm:$0xff]  ;;  %v754_v11 = vld [vmem:[#allocation8 + $0x138] sm:$0xff] }
  0xac   : > { %645 = vmatprep.subr.mxu0 %v1613_v24  ;;  %799 = vmatpush1.msra.mxu1 %v737_v12  ;;  %v727_v24 = vld [vmem:[#allocation8 + $0x60] sm:$0xff]  ;;  %v753_v12 = vld [vmem:[#allocation8 + $0x130] sm:$0xff] }
  0xad   : > { %646 = vmatpush1.msra.mxu0 %v1615_v25  ;;  %800 = vmatprep.subr.mxu1 %v736_v13  ;;  %v726_v25 = vld [vmem:[#allocation8 + $0x58] sm:$0xff]  ;;  %v752_v13 = vld [vmem:[#allocation8 + $0x128] sm:$0xff] }
  0xae   : > { %647 = vmatprep.subr.mxu0 %v1621_v27  ;;  %801 = vmatpush1.msra.mxu1 %v735_v14  ;;  %v724_v27 = vld [vmem:[#allocation8 + $0x48] sm:$0xff]  ;;  %v751_v14 = vld [vmem:[#allocation8 + $0x120] sm:$0xff] }
  0xaf   : > { %648 = vmatpush1.msra.mxu0 %v1631_v33  ;;  %802 = vmatprep.subr.mxu1 %v734_v16  ;;  %v723_v33 = vld [vmem:[#allocation8 + $0x40] sm:$0xff]  ;;  %v750_v16 = vld [vmem:[#allocation8 + $0x118] sm:$0xff] }
  0xb0   : > { %649 = vmatprep.subr.mxu0 %v1637_v35  ;;  %803 = vmatpush1.msra.mxu1 %v733_v17  ;;  %v722_v35 = vld [vmem:[#allocation8 + $0x38] sm:$0xff]  ;;  %v749_v17 = vld [vmem:[#allocation8 + $0x110] sm:$0xff] }
  0xb1   : > { %650 = vmatpush1.msra.mxu0 %v1642_v38  ;;  %804 = vmatprep.subr.mxu1 %v732_v18  ;;  %v721_v38 = vld [vmem:[#allocation8 + $0x30] sm:$0xff]  ;;  %v748_v18 = vld [vmem:[#allocation8 + $0x108] sm:$0xff] }
  0xb2   : > { %651 = vmatprep.subr.mxu0 %v1645_v40  ;;  %805 = vmatpush1.msra.mxu1 %v731_v19  ;;  %v720_v40 = vld [vmem:[#allocation8 + $0x28] sm:$0xff]  ;;  %v747_v19 = vld [vmem:[#allocation8 + $0x100] sm:$0xff] }
  0xb3   : > { %652 = vmatpush1.msra.mxu0 %v1648_v42  ;;  %806 = vmatprep.subr.mxu1 %v730_v21  ;;  %v719_v42 = vld [vmem:[#allocation8 + $0x20] sm:$0xff] }
  0xb4   : > { %653 = vmatprep.subr.mxu0 %v1651_v44  ;;  %807 = vmatpush1.msra.mxu1 %v729_v22  ;;  %v718_v44 = vld [vmem:[#allocation8 + $0x18] sm:$0xff] }
  0xb5   : > { %654 = vmatpush1.msra.mxu0 %v1654_v46  ;;  %808 = vmatprep.subr.mxu1 %v728_v23  ;;  %v717_v46 = vld [vmem:[#allocation8 + $0x10] sm:$0xff] }
  0xb6   : > { %655 = vmatprep.subr.mxu0 %v1657_v48  ;;  %809 = vmatpush1.msra.mxu1 %v727_v24  ;;  %v716_v48 = vld [vmem:[#allocation8 + $0x8] sm:$0xff] }
  0xb7   : > { %656 = vmatpush2.msra.mxu0 %v1660_v50  ;;  %810 = vmatprep.subr.mxu1 %v726_v25  ;;  %v715_v50 = vld [vmem:[#allocation8] sm:$0xff] }
  0xb8   : > { %657 = vmatprep.subr.mxu0 %v1663_v52  ;;  %v778_v52 = vld [vmem:[#allocation8 + $0x1f8] sm:$0xff] }
  0xb9   : > { %658 = vmatpush2.msra.mxu0 %v1666_v54  ;;  %v777_v54 = vld [vmem:[#allocation8 + $0x1f0] sm:$0xff] }
  0xba   : > { %659 = vmatprep.subr.mxu0 %v1669_v56  ;;  %v1361_v56 = vmov 1966171168  }
  0xbb   : > { %660 = vmatpush2.msra.mxu0 %v1672_v58  ;;  %v596_v58 = vunpack.c.l.s4 %v1361_v56 }
  0xbc   : > { %661 = vmatprep.subr.mxu0 %v1675_v60 }
  0xbd   : > { %662 = vmatpush2.msra.mxu0 %v1678_v62  ;;  %v597_v60 = vunpack.c.0.s8 %v596_v58 }
  0xbe   : > { %663 = vmatprep.subr.mxu0 %v1681_v15  ;;  %v1929_v15 = vld [vmem:[#allocation16_spill] sm:$0xff] }
  0xbf   : > { %664 = vmatpush2.msra.mxu0 %v1684_v30  ;;  %v1829_v30 = vsub.s32 %v597_v60, %v1929_v15 }
  0xc0   : > { %665 = vmatprep.subr.mxu0 %v1687_v32 }
  0xc1   : > { %666 = vmatpush2.msra.mxu0 %v1690_v37 }
  0xc2   : > { %667 = vmatprep.subr.mxu0 %v1693_v41 }
  0xc3   : > { %668 = vmatpush2.msra.mxu0 %v1696_v45 }
  0xc4   : > { %669 = vmatprep.subr.mxu0 %v1699_v49 }
  0xc5   : > { %670 = vmatpush2.msra.mxu0 %v1926_v0  ;;  %v765_v0 = vld [vmem:[#allocation8 + $0x190] sm:$0xff] }
  0xc6   : > { %671 = vmatprep.subr.mxu0 %v1927_v1  ;;  %v764_v1 = vld [vmem:[#allocation8 + $0x188] sm:$0xff] }
  0xc7   : > { %672 = vmatpush2.msra.mxu0 %v1928_v2  ;;  %v763_v2 = vld [vmem:[#allocation8 + $0x180] sm:$0xff] }
  0xc8   : > { %673 = vmatprep.subr.mxu0 %v1711_v29  ;;  %v1930_v29 = vld [vmem:[#allocation17_spill] sm:$0xff] }
  0xc9   : > { %674 = vmatpush2.msra.mxu0 %v1714_v36 }
  0xca   : > { %675 = vmatprep.subr.mxu0 %v1717_v43 }
  0xcb   : > { %676 = vmatpush2.msra.mxu0 %v1720_v51  ;;  %v776_v51 = vld [vmem:[#allocation8 + $0x1e8] sm:$0xff] }
  0xcc   : > { %677 = vmatprep.subr.mxu0 %v1726_v57 }
  0xcd   : > { %678 = vmatpush2.msra.mxu0 %v1731_v63  ;;  %v775_v63 = vld [vmem:[#allocation8 + $0x1e0] sm:$0xff] }
  0xce   : > { %679 = vmatprep.subr.mxu0 %v1736_v31  ;;  %v774_v31 = vld [vmem:[#allocation8 + $0x1d8] sm:$0xff] }
  0xcf   : > { %680 = vmatpush2.msra.mxu0 %v1739_v39  ;;  %v773_v39 = vld [vmem:[#allocation8 + $0x1d0] sm:$0xff] }
  0xd0   : > { %681 = vmatprep.subr.mxu0 %v1742_v26  ;;  %v725_v26 = vld [vmem:[#allocation8 + $0x50] sm:$0xff] }
  0xd1   : > { %682 = vmatpush2.msra.mxu0 %v1745_v47  ;;  %811 = vmatpush1.msra.mxu1 %v725_v26  ;;  %v772_v47 = vld [vmem:[#allocation8 + $0x1c8] sm:$0xff] }
  0xd2   : > { %683 = vmatprep.subr.mxu0 %v1748_v28  ;;  %812 = vmatprep.subr.mxu1 %v724_v27  ;;  %v770_v28 = vld [vmem:[#allocation8 + $0x1b8] sm:$0xff] }
  0xd3   : > { %684 = vmatpush2.msra.mxu0 %v1752_v55  ;;  %813 = vmatpush1.msra.mxu1 %v723_v33  ;;  %v769_v55 = vld [vmem:[#allocation8 + $0x1b0] sm:$0xff] }
  0xd4   : > { %685 = vmatprep.subr.mxu0 %v1756_v61  ;;  %814 = vmatprep.subr.mxu1 %v722_v35  ;;  %v768_v61 = vld [vmem:[#allocation8 + $0x1a8] sm:$0xff] }
  0xd5   : > { %686 = vmatpush2.msra.mxu0 %v1760_v20  ;;  %815 = vmatpush1.msra.mxu1 %v721_v38  ;;  %v767_v20 = vld [vmem:[#allocation8 + $0x1a0] sm:$0xff] }
  0xd6   : > { %816 = vmatprep.subr.mxu1 %v720_v40 }
  0xd7   : > { %817 = vmatpush1.msra.mxu1 %v719_v42 }
  0xd8   : > { %818 = vmatprep.subr.mxu1 %v718_v44 }
  0xd9   : > { %819 = vmatpush1.msra.mxu1 %v717_v46 }
  0xda   : > { %820 = vmatprep.subr.mxu1 %v716_v48  ;;  %v1362_v48 = vmov 0.0  }
  0xdb   : > { %821 = vmatpush1.msra.mxu1 %v715_v50  ;;  %865 = vst [vmem:[#allocation2] sm:$0xff] %v1362_v48 }
  0xdc   : > { %822 = vmatprep.subr.mxu1 %v778_v52 }
  0xdd   : > { %823 = vmatpush2.msra.mxu1 %v777_v54  ;;  %v875_v54 = vld [vmem:[%s1893_s4] sm:$0x1] }
  0xde   : > { %824 = vmatprep.subr.mxu1 %v776_v51 }
  0xdf   : > { %825 = vmatpush2.msra.mxu1 %v775_v63 }
  0xe0   : > { %826 = vmatprep.subr.mxu1 %v774_v31 }
  0xe1   : > { %827 = vmatpush2.msra.mxu1 %v773_v39 }
  0xe2   : > { %828 = vmatprep.subr.mxu1 %v772_v47  ;;  %v873_v50 = vld [vmem:[#allocation2 + $0x7] sm:$0x1] }
 0x156   : > { %v1051_v21 = vpop.f32.mrf.mxu0 }
 0x158   : > { %v1052_v22 = vpop.f32.mrf.mxu0 }
 0x159   : > { %v1053_v60 = vadd.f32 %v1052_v22, %v1051_v21 }
 0x162   : > { %v587_v62 = vpop.f32.mrf.mxu1 }
 0x164   : > { %v589_v32 = vpop.f32.mrf.mxu1 }
 0x165   : > { %v594_v37 = vcombine.low %v587_v62, %v589_v32 }
 0x167   : > { %v601_v41 = vrot.slane %v594_v37, %v1829_v30 }
 0x169   : > { %v608_v45 = vrot.slane %v601_v41, %v1829_v30 }
 0x16b   : > { %v1834_v49 = vsub.f32 %v1634_v34, %v608_v45  ;;  %v771_v34 = vld [vmem:[#allocation8 + $0x1c0] sm:$0xff] }
 0x16c   : > { %829 = vmatpush2.msra.mxu1 %v771_v34 }
 0x16d   : > { %v611_v57 = vmul.f32 %v1834_v49, %v1834_v49  ;;  %830 = vmatprep.subr.mxu1 %v770_v28 }
 0x16e   : > { %831 = vmatpush2.msra.mxu1 %v769_v55 }
 0x16f   : > { %v620_v36 = vrot.slane %v611_v57, %v1930_v29  ;;  %v616_v43 = vrot.slane %v611_v57, %v1723_v53  ;;  %832 = vmatprep.subr.mxu1 %v768_v61 }
 0x170   : > { %833 = vmatpush2.msra.mxu1 %v767_v20 }
 0x171   : > { %687 = vmatprep.mubr.f32.mxu0 %v620_v36  ;;  %834 = vmatprep.subr.mxu1 %v766_v59 }
 0x172   : > { %688 = vmatmul.mubr.f32.vlgmr.msra.gmra.mxu0 %v616_v43  ;;  %835 = vmatpush2.msra.mxu1 %v765_v0 }
 0x173   : > { %836 = vmatprep.subr.mxu1 %v764_v1 }
 0x174   : > { %837 = vmatpush2.msra.mxu1 %v763_v2 }
 0x175   : > { %838 = vmatprep.subr.mxu1 %v762_v3 }
 0x176   : > { %839 = vmatpush2.msra.mxu1 %v761_v4 }
 0x177   : > { %840 = vmatprep.subr.mxu1 %v760_v5 }
 0x178   : > { %841 = vmatpush2.msra.mxu1 %v759_v6 }
 0x179   : > { %842 = vmatprep.subr.mxu1 %v758_v7 }
 0x17a   : > { %843 = vmatpush2.msra.mxu1 %v757_v8 }
 0x17b   : > { %844 = vmatprep.subr.mxu1 %v756_v9 }
 0x17c   : > { %845 = vmatpush2.msra.mxu1 %v755_v10 }
 0x17d   : > { %846 = vmatprep.subr.mxu1 %v754_v11 }
 0x17e   : > { %847 = vmatpush2.msra.mxu1 %v753_v12 }
 0x17f   : > { %848 = vmatprep.subr.mxu1 %v752_v13 }
 0x180   : > { %849 = vmatpush2.msra.mxu1 %v751_v14 }
 0x181   : > { %850 = vmatprep.subr.mxu1 %v750_v16 }
 0x182   : > { %851 = vmatpush2.msra.mxu1 %v749_v17 }
 0x183   : > { %852 = vmatprep.subr.mxu1 %v748_v18 }
 0x184   : > { %853 = vmatpush2.msra.mxu1 %v747_v19 }
 0x232   : > { %v689_v23 = vpop.f32.mrf.mxu0 }
 0x233   : > { %v690_v24 = vadd.f32 1e-05, %v689_v23 }
 0x234   : > { %v691_v25 = vpop.f32.mrf.mxu0 }
 0x235   : > { %v692_v26 = vadd.f32 1e-05, %v691_v25  ;;  %1153 = vrsqrt.f32 %v690_v24 }
 0x237   : > { %1155 = vrsqrt.f32 %v692_v26 }
 0x242   : > { %v1154_v27 = vpop.eup %1153 }
 0x244   : > { %v1156_v33 = vpop.eup %1155 }
 0x245   : > { %v698_v35 = vcombine.low %v1154_v27, %v1156_v33 }
 0x247   : > { %v705_v38 = vrot.slane %v698_v35, %v1829_v30 }
 0x249   : > { %v712_v40 = vrot.slane %v705_v38, %v1829_v30 }
 0x24b   : > { %v714_v42 = vmul.f32 %v712_v40, %v1834_v49 }
 0x24d   : > { %v787_v44 = vrot.slane %v714_v42, %v1930_v29  ;;  %v783_v46 = vrot.slane %v714_v42, %v1723_v53 }
 0x24f   : > { %854 = vmatprep.mubr.f32.mxu1 %v787_v44 }
 0x250   : > { %855 = vmatmul.mubr.f32.vlgmr.msra.gmra.mxu1 %v783_v46 }
 0x310   : > { %v856_v52 = vpop.f32.mrf.mxu1 }
 0x311   : > { %v874_v56 = vadd.f32 %v873_v50, %v856_v52 }
 0x312   : > { %v858_v58 = vpop.f32.mrf.mxu1 }
 0x313   : > { %v876_v62 = vadd.f32 %v875_v54, %v874_v56 }
 0x315   : > { %v877_v53 = vmul.f32 %v1053_v60, %v876_v62 }
 0x317   : > { %878 = vst [vmem:[%s328_s30] sm:$0x1] %v877_v53 }
 0x318   : > { %1276 = shalt.err (!%p1273_p13)
}
 0x319   : > { %s1277_s15 = scalar_lea.hbm %s891_s28, 16  ;;  %s1281_s2 = scalar_lea.hbm %s1895_s6, 32 }
 0x31a   : > { %p1278_p1 = scmp.ne.s32.totalorder %s891_s28, %s1277_s15  ;;  %p1282_p12 = scmp.lt.s32.totalorder %s891_s28, %s1895_s6 }
 0x31b   : > { %p1283_p5 = scmp.lt.s32.totalorder %s1281_s2, %s1277_s15 }
 0x31c   : > { %p1279_p4 = pnand %p1278_p1, %p1499_p0 }
 0x31d   : > { %p1284_p3 = por %p1283_p5, %p1282_p12 }
 0x31e   : > { %p1280_p8 = pneg %p1279_p4 }
 0x320   : > { %p1285_p10 = pnand %p1284_p3, %p1280_p8 }
 0x322   : > { %1288 = shalt.err (!%p1285_p10)
}
 0x323   : > { %1068 = dma.vmem_to_hbm [thread:$0]  (%p1499_p0), %s894_s14, 16, %s891_s28, %s880_s19  }
 0x324 PF: > { %s905_s9 = sand.u32 1, %s1331_s21   ;;  %p1931_p2 = scmp.ne.s32.totalorder %s1911_s8, 0 }
 0x325   : > { %p1932_p11 = scmp.ge.s32.totalorder %s1351_s26, 2  ;;  %s906_s30 = scalar_lea.sflag [#allocation5], %s905_s9 }
 0x327   : > { %p1085_p7 = pnand %p1932_p11, %p1931_p2 }
 0x329   : > { %p1086_p6 = pneg %p1085_p7 }
 0x32b   : > { %1326 = dma.done.wait (%p1086_p6), %s906_s30, 16  }
 0x32c   : > { %1328 = vsyncadd (%p1086_p6), %s906_s30, 4294967280  ;;  %s24_s26 = sadd.s32 1, %s1351_s26   ;;  %s1933_s21 = smov %s1335_s22 }
 0x32d   : > { %p21_p9 = scmp.ge.s32.totalorder %s24_s26, 4   ;;  %s1934_s22 = smov %s1339_s23 }
 0x32e   : > { %s1935_s23 = smov %s1511_s13  ;;  %s1936_s24 = smov %s1347_s25 }
 0x32f   : > { %s1937_s25 = smov %s1939_s20  ;;  %23 = sbr.rel (!%p21_p9) target bundleno = 11 (0xb), region = 109 }
 0x334   :  { %910 = vsyncpa [#allocation4], 1 }
 0x335   :  { %912 = vsyncpa [#allocation4 + $0x1], 1 }
 0x336   :  { %913 = vsyncpa [#allocation7], 1 }
 0x337   :  { %914 = vsyncpa [#allocation10], 1 }
 0x338   :  { %915 = vsyncpa [#allocation5], 1 }
 0x339   :  { %917 = vsyncpa [#allocation5 + $0x1], 1 }

</bundles_post_ra>
